<compile_context>
chip_gen: v5e
topology: v5e:2x2
jax: 0.10.0
libtpu: 0.0.40
codegen_flags: <defaults>
</compile_context>

<pallas_src>
import jax
import jax.numpy as jnp
from jax.experimental import pallas as pl
from jax.experimental.pallas import tpu as pltpu

N_BINS = 100         # MyMonotoneNN.forward default N
N_PAD = 128          # bins padded to a full lane group; padding masked to 0
LOWER_BOUND = -0.5   # MyMonotoneNN.forward default lower_bound
INPUT_SIZE = 5
Z_DIM = 4
OUT_W = 8            # packed output width: [z_0..z_3, xbeta, 0, 0, 0]
MAX_TILE = 1024      # batch rows processed per grid step


def _round_up(a, b):
    return -(-a // b) * b


def _uniform01_from_counter(ctr_u32):
    """Counter-based hash -> U[0, 1) float32 using only plain jnp uint32 ops
    (portable across Mosaic TPU lowering and interpret mode)."""
    x = ctr_u32
    x = x ^ (x >> 16)
    x = x * jnp.uint32(0x7FEB352D)
    x = x ^ (x >> 15)
    x = x * jnp.uint32(0x846CA68B)
    x = x ^ (x >> 16)
    top24 = (x >> 8).astype(jnp.int32)                 # value in [0, 2^24)
    return top24.astype(jnp.float32) * jnp.float32(1.0 / (1 << 24))


def net2_kernel(seed_ref,                                  # scalar prefetch (SMEM)
                x_ref, wnet_ref, bnet_ref, wmlp_ref, bmlp_ref, wlin_ref, blin_ref,
                out_ref):
    tb = x_ref.shape[0]

    # --- self.net : Linear(5, 4) -- tiny; VPU broadcast-FMA, no MXU needed ---
    x = x_ref[...]                                                        # (tb, 5)
    w = wnet_ref[...]                                                     # (5, 4)
    z = x[:, 0:1] * w[0:1, :] + bnet_ref[...]                             # (tb, 4)
    for c in range(1, INPUT_SIZE):
        z = z + x[:, c:c + 1] * w[c:c + 1, :]

    # --- MyMonotoneNN: clamp + trapezoid step size ---
    z_clamp = jnp.maximum(z, LOWER_BOUND)
    d = (z_clamp - LOWER_BOUND) * jnp.float32(1.0 / (N_BINS - 1))         # (tb, 4)

    # Hoisted lane/row index tensors shared by all 4 latent dims.
    row = jax.lax.broadcasted_iota(jnp.int32, (tb, N_PAD), 0) \
        + pl.program_id(0) * tb                                           # global row
    lane = jax.lax.broadcasted_iota(jnp.int32, (tb, N_PAD), 1)            # (tb, 128)
    jf = lane.astype(jnp.float32)
    noise_mask = lane < (N_BINS - 1)                  # noise==0 at bin N-1 & padding
    bin_mask = (lane < N_BINS).astype(jnp.float32)    # padded bins contribute 0

    # Unique per-(row, dim, bin) counter stream mixed with the seed.
    seed_u = seed_ref[0].astype(jnp.uint32) * jnp.uint32(0x9E3779B9)
    base_ctr = (row * (Z_DIM * N_PAD) + lane).astype(jnp.uint32) + seed_u

    acc = jnp.zeros((tb, 1), jnp.float32)
    for k in range(Z_DIM):
        w_k = wmlp_ref[:, k:k + 1]                                        # (1, 1)
        b_k = bmlp_ref[:, k:k + 1]                                        # (1, 1)
        l_k = wlin_ref[:, k:k + 1]                                        # (1, 1)
        d_k = d[:, k:k + 1]                                               # (tb, 1)

        # u ~ U[0, 1) from the counter hash; zeroed at bin N-1 and padding.
        u = _uniform01_from_counter(base_ctr + jnp.uint32(k * N_PAD))     # (tb, 128)
        u = jnp.where(noise_mask, u, 0.0)

        # Folded per-bin affine: w_k*(d*(j+u) + LB) + b_k = a*(j+u) + off
        a = d_k * w_k                                                     # (tb, 1)
        off = b_k + w_k * jnp.float32(LOWER_BOUND)                        # (1, 1)
        arg = a * (jf + u) + off                                          # (tb, 128)

        # ELU(arg) + 1 == arg + 1 (arg > 0) | exp(arg) (arg <= 0); overflow-guarded.
        h = jnp.where(arg > 0.0, arg + 1.0, jnp.exp(jnp.minimum(arg, 0.0)))
        hsum = jnp.sum(h * bin_mask, axis=-1, keepdims=True)              # (tb, 1)

        # Hz_k = d_k * hsum ; xbeta accumulates wlin_k * Hz_k (no 4x1 matmul).
        acc = acc + l_k * (d_k * hsum)

    xbeta = jnp.minimum(acc + blin_ref[...], 30.0)                        # (tb, 1)

    # Single packed output store: [z(4) | xbeta(1) | pad(3)]
    out_ref[...] = jnp.concatenate(
        [z, xbeta, jnp.zeros((tb, OUT_W - Z_DIM - 1), jnp.float32)], axis=1)


def init_params(key):
    """Deterministic PyTorch-style uniform(-1/sqrt(fan_in), 1/sqrt(fan_in)) init."""
    ks = jax.random.split(key, 6)

    def unif(k, shape, fan_in):
        bound = 1.0 / jnp.sqrt(jnp.float32(fan_in))
        return jax.random.uniform(k, shape, jnp.float32, -bound, bound)

    return {
        # self.net : Linear(5, 4), stored transposed as (in, out)
        "wnet": unif(ks[0], (INPUT_SIZE, Z_DIM), INPUT_SIZE),
        "bnet": unif(ks[1], (1, Z_DIM), INPUT_SIZE),
        # four MLP_block heads (Linear(1,1) each): scalar weight / bias per head
        "wmlp": unif(ks[2], (1, Z_DIM), 1),
        "bmlp": unif(ks[3], (1, Z_DIM), 1),
        # self.linearity : Linear(4, 1), stored as a (1, 4) row
        "wlin": unif(ks[4], (1, Z_DIM), Z_DIM),
        "blin": unif(ks[5], (1, 1), Z_DIM),
    }


def net2_forward(x, params, seed=0, N=None, lower_bound=None):
    """N / lower_bound are accepted but ignored, exactly like the torch Net2.forward
    (its mnn call always uses the defaults N=100, lower_bound=-0.5)."""
    n = x.shape[0]
    tb = min(MAX_TILE, _round_up(n, 8))
    n_pad = _round_up(n, tb)
    x_p = jnp.pad(x, ((0, n_pad - n), (0, 0))) if n_pad != n else x
    seed_arr = jnp.asarray([seed], dtype=jnp.int32)

    grid_spec = pltpu.PrefetchScalarGridSpec(
        num_scalar_prefetch=1,
        grid=(n_pad // tb,),
        in_specs=[
            pl.BlockSpec((tb, INPUT_SIZE), lambda i, s: (i, 0)),      # x (tiled)
            pl.BlockSpec((INPUT_SIZE, Z_DIM), lambda i, s: (0, 0)),   # wnet (resident)
            pl.BlockSpec((1, Z_DIM), lambda i, s: (0, 0)),            # bnet
            pl.BlockSpec((1, Z_DIM), lambda i, s: (0, 0)),            # wmlp
            pl.BlockSpec((1, Z_DIM), lambda i, s: (0, 0)),            # bmlp
            pl.BlockSpec((1, Z_DIM), lambda i, s: (0, 0)),            # wlin
            pl.BlockSpec((1, 1), lambda i, s: (0, 0)),                # blin
        ],
        out_specs=pl.BlockSpec((tb, OUT_W), lambda i, s: (i, 0)),
    )

    out = pl.pallas_call(
        net2_kernel,
        out_shape=jax.ShapeDtypeStruct((n_pad, OUT_W), jnp.float32),
        grid_spec=grid_spec,
        compiler_params=pltpu.CompilerParams(
            dimension_semantics=("parallel",)),
    )(seed_arr, x_p,
      params["wnet"], params["bnet"],
      params["wmlp"], params["bmlp"],
      params["wlin"], params["blin"])

    z_ = out[:n, :Z_DIM]
    xbeta = out[:n, Z_DIM:Z_DIM + 1]
    return xbeta, z_


if __name__ == "__main__":
    key = jax.random.PRNGKey(0)
    k_x, k_p = jax.random.split(key, 2)

    n_batch = 2
    x = jax.random.normal(k_x, (n_batch, INPUT_SIZE), jnp.float32)
    params = init_params(k_p)

    xbeta, z_ = net2_forward(x, params, seed=0, N=100, lower_bound=-0.5)
    jax.block_until_ready((xbeta, z_))

    assert xbeta.shape == (n_batch, 1) and z_.shape == (n_batch, Z_DIM)
    # Deterministic part of the forward: z_ must equal the encoder Linear(5, 4).
    z_ref = x @ params["wnet"] + params["bnet"]
    assert jnp.allclose(z_, z_ref, atol=1e-4, rtol=1e-4)
    assert bool(jnp.all(jnp.isfinite(xbeta))) and bool(jnp.all(xbeta <= 30.0))
    print("KERNEL_OK")
</pallas_src>

<mosaic_0001>
module attributes {stable_mosaic.version = 11 : i64} {
  func.func @net2_kernel(%arg0: i32, %arg1: memref<1xi32, #tpu.memory_space<smem>>, %arg2: memref<8x5xf32, #tpu.memory_space<vmem>>, %arg3: memref<5x4xf32, #tpu.memory_space<vmem>>, %arg4: memref<1x4xf32, #tpu.memory_space<vmem>>, %arg5: memref<1x4xf32, #tpu.memory_space<vmem>>, %arg6: memref<1x4xf32, #tpu.memory_space<vmem>>, %arg7: memref<1x4xf32, #tpu.memory_space<vmem>>, %arg8: memref<1x1xf32, #tpu.memory_space<vmem>>, %arg9: memref<8x8xf32, #tpu.memory_space<vmem>>) attributes {dimension_semantics = [#tpu.dimension_semantics<parallel>], iteration_bounds = array<i64: 1>, scalar_prefetch = 1 : i64, scratch_operands = 0 : i64, tpu.core_type = #tpu.core_type<tc>, window_params = [{transform_indices = @transform_0, window_bounds = array<i64: 8, 5>}, {pipeline_mode = #tpu.pipeline_mode<synchronous>, transform_indices = @transform_1, window_bounds = array<i64: 5, 4>}, {pipeline_mode = #tpu.pipeline_mode<synchronous>, transform_indices = @transform_2, window_bounds = array<i64: 1, 4>}, {pipeline_mode = #tpu.pipeline_mode<synchronous>, transform_indices = @transform_3, window_bounds = array<i64: 1, 4>}, {pipeline_mode = #tpu.pipeline_mode<synchronous>, transform_indices = @transform_4, window_bounds = array<i64: 1, 4>}, {pipeline_mode = #tpu.pipeline_mode<synchronous>, transform_indices = @transform_5, window_bounds = array<i64: 1, 4>}, {pipeline_mode = #tpu.pipeline_mode<synchronous>, transform_indices = @transform_6, window_bounds = array<i64: 1, 1>}, {transform_indices = @transform_7, window_bounds = array<i64: 8, 8>}]} {
    %c0 = arith.constant 0 : index
    %c0_0 = arith.constant 0 : index
    %0 = vector.load %arg2[%c0, %c0_0] : memref<8x5xf32, #tpu.memory_space<vmem>>, vector<8x5xf32>
    %c0_1 = arith.constant 0 : index
    %c0_2 = arith.constant 0 : index
    %1 = vector.load %arg3[%c0_1, %c0_2] : memref<5x4xf32, #tpu.memory_space<vmem>>, vector<5x4xf32>
    %2 = vector.extract_strided_slice %0 {offsets = [0, 0], sizes = [8, 1], strides = [1, 1]} : vector<8x5xf32> to vector<8x1xf32>
    %3 = vector.extract_strided_slice %1 {offsets = [0, 0], sizes = [1, 4], strides = [1, 1]} : vector<5x4xf32> to vector<1x4xf32>
    %4 = vector.broadcast %2 : vector<8x1xf32> to vector<8x4xf32>
    %5 = vector.broadcast %3 : vector<1x4xf32> to vector<8x4xf32>
    %6 = arith.mulf %4, %5 : vector<8x4xf32>
    %c0_3 = arith.constant 0 : index
    %c0_4 = arith.constant 0 : index
    %7 = vector.load %arg4[%c0_3, %c0_4] : memref<1x4xf32, #tpu.memory_space<vmem>>, vector<1x4xf32>
    %8 = vector.broadcast %7 : vector<1x4xf32> to vector<8x4xf32>
    %9 = arith.addf %6, %8 : vector<8x4xf32>
    %10 = vector.extract_strided_slice %0 {offsets = [0, 1], sizes = [8, 1], strides = [1, 1]} : vector<8x5xf32> to vector<8x1xf32>
    %11 = vector.extract_strided_slice %1 {offsets = [1, 0], sizes = [1, 4], strides = [1, 1]} : vector<5x4xf32> to vector<1x4xf32>
    %12 = vector.broadcast %10 : vector<8x1xf32> to vector<8x4xf32>
    %13 = vector.broadcast %11 : vector<1x4xf32> to vector<8x4xf32>
    %14 = arith.mulf %12, %13 : vector<8x4xf32>
    %15 = arith.addf %9, %14 : vector<8x4xf32>
    %16 = vector.extract_strided_slice %0 {offsets = [0, 2], sizes = [8, 1], strides = [1, 1]} : vector<8x5xf32> to vector<8x1xf32>
    %17 = vector.extract_strided_slice %1 {offsets = [2, 0], sizes = [1, 4], strides = [1, 1]} : vector<5x4xf32> to vector<1x4xf32>
    %18 = vector.broadcast %16 : vector<8x1xf32> to vector<8x4xf32>
    %19 = vector.broadcast %17 : vector<1x4xf32> to vector<8x4xf32>
    %20 = arith.mulf %18, %19 : vector<8x4xf32>
    %21 = arith.addf %15, %20 : vector<8x4xf32>
    %22 = vector.extract_strided_slice %0 {offsets = [0, 3], sizes = [8, 1], strides = [1, 1]} : vector<8x5xf32> to vector<8x1xf32>
    %23 = vector.extract_strided_slice %1 {offsets = [3, 0], sizes = [1, 4], strides = [1, 1]} : vector<5x4xf32> to vector<1x4xf32>
    %24 = vector.broadcast %22 : vector<8x1xf32> to vector<8x4xf32>
    %25 = vector.broadcast %23 : vector<1x4xf32> to vector<8x4xf32>
    %26 = arith.mulf %24, %25 : vector<8x4xf32>
    %27 = arith.addf %21, %26 : vector<8x4xf32>
    %28 = vector.extract_strided_slice %0 {offsets = [0, 4], sizes = [8, 1], strides = [1, 1]} : vector<8x5xf32> to vector<8x1xf32>
    %29 = vector.extract_strided_slice %1 {offsets = [4, 0], sizes = [1, 4], strides = [1, 1]} : vector<5x4xf32> to vector<1x4xf32>
    %30 = vector.broadcast %28 : vector<8x1xf32> to vector<8x4xf32>
    %31 = vector.broadcast %29 : vector<1x4xf32> to vector<8x4xf32>
    %32 = arith.mulf %30, %31 : vector<8x4xf32>
    %33 = arith.addf %27, %32 : vector<8x4xf32>
    %cst = arith.constant -5.000000e-01 : f32
    %34 = vector.broadcast %cst : f32 to vector<8x4xf32>
    %35 = arith.maximumf %33, %34 : vector<8x4xf32>
    %cst_5 = arith.constant -5.000000e-01 : f32
    %36 = vector.broadcast %cst_5 : f32 to vector<8x4xf32>
    %37 = arith.subf %35, %36 : vector<8x4xf32>
    %cst_6 = arith.constant 0.0101010101 : f32
    %38 = vector.broadcast %cst_6 : f32 to vector<8x4xf32>
    %39 = arith.mulf %37, %38 : vector<8x4xf32>
    %40 = tpu.iota {dimensions = array<i32: 0>} : vector<8x128xi32>
    %c8_i32 = arith.constant 8 : i32
    %41 = arith.muli %arg0, %c8_i32 : i32
    %42 = vector.broadcast %41 : i32 to vector<8x128xi32>
    %43 = arith.addi %40, %42 : vector<8x128xi32>
    %44 = tpu.iota {dimensions = array<i32: 1>} : vector<8x128xi32>
    %45 = arith.sitofp %44 : vector<8x128xi32> to vector<8x128xf32>
    %c99_i32 = arith.constant 99 : i32
    %46 = vector.broadcast %c99_i32 : i32 to vector<8x128xi32>
    %47 = arith.cmpi slt, %44, %46 : vector<8x128xi32>
    %c100_i32 = arith.constant 100 : i32
    %48 = vector.broadcast %c100_i32 : i32 to vector<8x128xi32>
    %49 = arith.cmpi slt, %44, %48 : vector<8x128xi32>
    %50 = arith.extui %49 : vector<8x128xi1> to vector<8x128xi32>
    %51 = arith.sitofp %50 : vector<8x128xi32> to vector<8x128xf32>
    %c0_7 = arith.constant 0 : index
    %52 = memref.load %arg1[%c0_7] : memref<1xi32, #tpu.memory_space<smem>>
    %c-1640531527_i32 = arith.constant -1640531527 : i32
    %53 = arith.muli %52, %c-1640531527_i32 : i32
    %c512_i32 = arith.constant 512 : i32
    %54 = vector.broadcast %c512_i32 : i32 to vector<8x128xi32>
    %55 = arith.muli %43, %54 : vector<8x128xi32>
    %56 = arith.addi %55, %44 : vector<8x128xi32>
    %57 = vector.broadcast %53 : i32 to vector<8x128xi32>
    %58 = arith.addi %56, %57 : vector<8x128xi32>
    %cst_8 = arith.constant 0.000000e+00 : f32
    %59 = vector.broadcast %cst_8 : f32 to vector<8x1xf32>
    %c0_9 = arith.constant 0 : index
    %c0_10 = arith.constant 0 : index
    %60 = vector.load %arg5[%c0_9, %c0_10] : memref<1x4xf32, #tpu.memory_space<vmem>>, vector<1x1xf32>
    %c0_11 = arith.constant 0 : index
    %c0_12 = arith.constant 0 : index
    %61 = vector.load %arg6[%c0_11, %c0_12] : memref<1x4xf32, #tpu.memory_space<vmem>>, vector<1x1xf32>
    %c0_13 = arith.constant 0 : index
    %c0_14 = arith.constant 0 : index
    %62 = vector.load %arg7[%c0_13, %c0_14] : memref<1x4xf32, #tpu.memory_space<vmem>>, vector<1x1xf32>
    %63 = vector.extract_strided_slice %39 {offsets = [0, 0], sizes = [8, 1], strides = [1, 1]} : vector<8x4xf32> to vector<8x1xf32>
    %c0_i32 = arith.constant 0 : i32
    %64 = vector.broadcast %c0_i32 : i32 to vector<8x128xi32>
    %65 = arith.addi %58, %64 : vector<8x128xi32>
    %c16_i32 = arith.constant 16 : i32
    %66 = vector.broadcast %c16_i32 : i32 to vector<8x128xi32>
    %67 = arith.shrui %65, %66 : vector<8x128xi32>
    %68 = arith.xori %65, %67 : vector<8x128xi32>
    %c2146121005_i32 = arith.constant 2146121005 : i32
    %69 = vector.broadcast %c2146121005_i32 : i32 to vector<8x128xi32>
    %70 = arith.muli %68, %69 : vector<8x128xi32>
    %c15_i32 = arith.constant 15 : i32
    %71 = vector.broadcast %c15_i32 : i32 to vector<8x128xi32>
    %72 = arith.shrui %70, %71 : vector<8x128xi32>
    %73 = arith.xori %70, %72 : vector<8x128xi32>
    %c-2073254261_i32 = arith.constant -2073254261 : i32
    %74 = vector.broadcast %c-2073254261_i32 : i32 to vector<8x128xi32>
    %75 = arith.muli %73, %74 : vector<8x128xi32>
    %c16_i32_15 = arith.constant 16 : i32
    %76 = vector.broadcast %c16_i32_15 : i32 to vector<8x128xi32>
    %77 = arith.shrui %75, %76 : vector<8x128xi32>
    %78 = arith.xori %75, %77 : vector<8x128xi32>
    %c8_i32_16 = arith.constant 8 : i32
    %79 = vector.broadcast %c8_i32_16 : i32 to vector<8x128xi32>
    %80 = arith.shrui %78, %79 : vector<8x128xi32>
    %81 = arith.sitofp %80 : vector<8x128xi32> to vector<8x128xf32>
    %cst_17 = arith.constant 5.96046448E-8 : f32
    %82 = vector.broadcast %cst_17 : f32 to vector<8x128xf32>
    %83 = arith.mulf %81, %82 : vector<8x128xf32>
    %cst_18 = arith.constant 0.000000e+00 : f32
    %84 = vector.broadcast %cst_18 : f32 to vector<8x128xf32>
    %85 = arith.select %47, %83, %84 : vector<8x128xi1>, vector<8x128xf32>
    %86 = vector.broadcast %60 : vector<1x1xf32> to vector<8x1xf32>
    %87 = arith.mulf %63, %86 : vector<8x1xf32>
    %cst_19 = arith.constant -5.000000e-01 : f32
    %88 = vector.broadcast %cst_19 : f32 to vector<1x1xf32>
    %89 = arith.mulf %60, %88 : vector<1x1xf32>
    %90 = arith.addf %61, %89 : vector<1x1xf32>
    %91 = arith.addf %45, %85 : vector<8x128xf32>
    %92 = vector.broadcast %87 : vector<8x1xf32> to vector<8x128xf32>
    %93 = arith.mulf %92, %91 : vector<8x128xf32>
    %94 = vector.broadcast %90 : vector<1x1xf32> to vector<8x128xf32>
    %95 = arith.addf %93, %94 : vector<8x128xf32>
    %cst_20 = arith.constant 0.000000e+00 : f32
    %96 = vector.broadcast %cst_20 : f32 to vector<8x128xf32>
    %97 = arith.cmpf ogt, %95, %96 : vector<8x128xf32>
    %cst_21 = arith.constant 1.000000e+00 : f32
    %98 = vector.broadcast %cst_21 : f32 to vector<8x128xf32>
    %99 = arith.addf %95, %98 : vector<8x128xf32>
    %cst_22 = arith.constant 0.000000e+00 : f32
    %100 = vector.broadcast %cst_22 : f32 to vector<8x128xf32>
    %101 = arith.minimumf %95, %100 : vector<8x128xf32>
    %102 = math.exp %101 : vector<8x128xf32>
    %103 = arith.select %97, %99, %102 : vector<8x128xi1>, vector<8x128xf32>
    %104 = arith.mulf %103, %51 : vector<8x128xf32>
    %cst_23 = arith.constant dense<0.000000e+00> : vector<8xf32>
    %105 = vector.multi_reduction <add>, %104, %cst_23 [1] : vector<8x128xf32> to vector<8xf32>
    %106 = vector.shape_cast %105 : vector<8xf32> to vector<8x1xf32>
    %107 = arith.mulf %63, %106 : vector<8x1xf32>
    %108 = vector.broadcast %62 : vector<1x1xf32> to vector<8x1xf32>
    %109 = arith.mulf %108, %107 : vector<8x1xf32>
    %110 = arith.addf %59, %109 : vector<8x1xf32>
    %c0_24 = arith.constant 0 : index
    %c1 = arith.constant 1 : index
    %111 = vector.load %arg5[%c0_24, %c1] : memref<1x4xf32, #tpu.memory_space<vmem>>, vector<1x1xf32>
    %c0_25 = arith.constant 0 : index
    %c1_26 = arith.constant 1 : index
    %112 = vector.load %arg6[%c0_25, %c1_26] : memref<1x4xf32, #tpu.memory_space<vmem>>, vector<1x1xf32>
    %c0_27 = arith.constant 0 : index
    %c1_28 = arith.constant 1 : index
    %113 = vector.load %arg7[%c0_27, %c1_28] : memref<1x4xf32, #tpu.memory_space<vmem>>, vector<1x1xf32>
    %114 = vector.extract_strided_slice %39 {offsets = [0, 1], sizes = [8, 1], strides = [1, 1]} : vector<8x4xf32> to vector<8x1xf32>
    %c128_i32 = arith.constant 128 : i32
    %115 = vector.broadcast %c128_i32 : i32 to vector<8x128xi32>
    %116 = arith.addi %58, %115 : vector<8x128xi32>
    %c16_i32_29 = arith.constant 16 : i32
    %117 = vector.broadcast %c16_i32_29 : i32 to vector<8x128xi32>
    %118 = arith.shrui %116, %117 : vector<8x128xi32>
    %119 = arith.xori %116, %118 : vector<8x128xi32>
    %c2146121005_i32_30 = arith.constant 2146121005 : i32
    %120 = vector.broadcast %c2146121005_i32_30 : i32 to vector<8x128xi32>
    %121 = arith.muli %119, %120 : vector<8x128xi32>
    %c15_i32_31 = arith.constant 15 : i32
    %122 = vector.broadcast %c15_i32_31 : i32 to vector<8x128xi32>
    %123 = arith.shrui %121, %122 : vector<8x128xi32>
    %124 = arith.xori %121, %123 : vector<8x128xi32>
    %c-2073254261_i32_32 = arith.constant -2073254261 : i32
    %125 = vector.broadcast %c-2073254261_i32_32 : i32 to vector<8x128xi32>
    %126 = arith.muli %124, %125 : vector<8x128xi32>
    %c16_i32_33 = arith.constant 16 : i32
    %127 = vector.broadcast %c16_i32_33 : i32 to vector<8x128xi32>
    %128 = arith.shrui %126, %127 : vector<8x128xi32>
    %129 = arith.xori %126, %128 : vector<8x128xi32>
    %c8_i32_34 = arith.constant 8 : i32
    %130 = vector.broadcast %c8_i32_34 : i32 to vector<8x128xi32>
    %131 = arith.shrui %129, %130 : vector<8x128xi32>
    %132 = arith.sitofp %131 : vector<8x128xi32> to vector<8x128xf32>
    %cst_35 = arith.constant 5.96046448E-8 : f32
    %133 = vector.broadcast %cst_35 : f32 to vector<8x128xf32>
    %134 = arith.mulf %132, %133 : vector<8x128xf32>
    %cst_36 = arith.constant 0.000000e+00 : f32
    %135 = vector.broadcast %cst_36 : f32 to vector<8x128xf32>
    %136 = arith.select %47, %134, %135 : vector<8x128xi1>, vector<8x128xf32>
    %137 = vector.broadcast %111 : vector<1x1xf32> to vector<8x1xf32>
    %138 = arith.mulf %114, %137 : vector<8x1xf32>
    %cst_37 = arith.constant -5.000000e-01 : f32
    %139 = vector.broadcast %cst_37 : f32 to vector<1x1xf32>
    %140 = arith.mulf %111, %139 : vector<1x1xf32>
    %141 = arith.addf %112, %140 : vector<1x1xf32>
    %142 = arith.addf %45, %136 : vector<8x128xf32>
    %143 = vector.broadcast %138 : vector<8x1xf32> to vector<8x128xf32>
    %144 = arith.mulf %143, %142 : vector<8x128xf32>
    %145 = vector.broadcast %141 : vector<1x1xf32> to vector<8x128xf32>
    %146 = arith.addf %144, %145 : vector<8x128xf32>
    %cst_38 = arith.constant 0.000000e+00 : f32
    %147 = vector.broadcast %cst_38 : f32 to vector<8x128xf32>
    %148 = arith.cmpf ogt, %146, %147 : vector<8x128xf32>
    %cst_39 = arith.constant 1.000000e+00 : f32
    %149 = vector.broadcast %cst_39 : f32 to vector<8x128xf32>
    %150 = arith.addf %146, %149 : vector<8x128xf32>
    %cst_40 = arith.constant 0.000000e+00 : f32
    %151 = vector.broadcast %cst_40 : f32 to vector<8x128xf32>
    %152 = arith.minimumf %146, %151 : vector<8x128xf32>
    %153 = math.exp %152 : vector<8x128xf32>
    %154 = arith.select %148, %150, %153 : vector<8x128xi1>, vector<8x128xf32>
    %155 = arith.mulf %154, %51 : vector<8x128xf32>
    %cst_41 = arith.constant dense<0.000000e+00> : vector<8xf32>
    %156 = vector.multi_reduction <add>, %155, %cst_41 [1] : vector<8x128xf32> to vector<8xf32>
    %157 = vector.shape_cast %156 : vector<8xf32> to vector<8x1xf32>
    %158 = arith.mulf %114, %157 : vector<8x1xf32>
    %159 = vector.broadcast %113 : vector<1x1xf32> to vector<8x1xf32>
    %160 = arith.mulf %159, %158 : vector<8x1xf32>
    %161 = arith.addf %110, %160 : vector<8x1xf32>
    %c0_42 = arith.constant 0 : index
    %c2 = arith.constant 2 : index
    %162 = vector.load %arg5[%c0_42, %c2] : memref<1x4xf32, #tpu.memory_space<vmem>>, vector<1x1xf32>
    %c0_43 = arith.constant 0 : index
    %c2_44 = arith.constant 2 : index
    %163 = vector.load %arg6[%c0_43, %c2_44] : memref<1x4xf32, #tpu.memory_space<vmem>>, vector<1x1xf32>
    %c0_45 = arith.constant 0 : index
    %c2_46 = arith.constant 2 : index
    %164 = vector.load %arg7[%c0_45, %c2_46] : memref<1x4xf32, #tpu.memory_space<vmem>>, vector<1x1xf32>
    %165 = vector.extract_strided_slice %39 {offsets = [0, 2], sizes = [8, 1], strides = [1, 1]} : vector<8x4xf32> to vector<8x1xf32>
    %c256_i32 = arith.constant 256 : i32
    %166 = vector.broadcast %c256_i32 : i32 to vector<8x128xi32>
    %167 = arith.addi %58, %166 : vector<8x128xi32>
    %c16_i32_47 = arith.constant 16 : i32
    %168 = vector.broadcast %c16_i32_47 : i32 to vector<8x128xi32>
    %169 = arith.shrui %167, %168 : vector<8x128xi32>
    %170 = arith.xori %167, %169 : vector<8x128xi32>
    %c2146121005_i32_48 = arith.constant 2146121005 : i32
    %171 = vector.broadcast %c2146121005_i32_48 : i32 to vector<8x128xi32>
    %172 = arith.muli %170, %171 : vector<8x128xi32>
    %c15_i32_49 = arith.constant 15 : i32
    %173 = vector.broadcast %c15_i32_49 : i32 to vector<8x128xi32>
    %174 = arith.shrui %172, %173 : vector<8x128xi32>
    %175 = arith.xori %172, %174 : vector<8x128xi32>
    %c-2073254261_i32_50 = arith.constant -2073254261 : i32
    %176 = vector.broadcast %c-2073254261_i32_50 : i32 to vector<8x128xi32>
    %177 = arith.muli %175, %176 : vector<8x128xi32>
    %c16_i32_51 = arith.constant 16 : i32
    %178 = vector.broadcast %c16_i32_51 : i32 to vector<8x128xi32>
    %179 = arith.shrui %177, %178 : vector<8x128xi32>
    %180 = arith.xori %177, %179 : vector<8x128xi32>
    %c8_i32_52 = arith.constant 8 : i32
    %181 = vector.broadcast %c8_i32_52 : i32 to vector<8x128xi32>
    %182 = arith.shrui %180, %181 : vector<8x128xi32>
    %183 = arith.sitofp %182 : vector<8x128xi32> to vector<8x128xf32>
    %cst_53 = arith.constant 5.96046448E-8 : f32
    %184 = vector.broadcast %cst_53 : f32 to vector<8x128xf32>
    %185 = arith.mulf %183, %184 : vector<8x128xf32>
    %cst_54 = arith.constant 0.000000e+00 : f32
    %186 = vector.broadcast %cst_54 : f32 to vector<8x128xf32>
    %187 = arith.select %47, %185, %186 : vector<8x128xi1>, vector<8x128xf32>
    %188 = vector.broadcast %162 : vector<1x1xf32> to vector<8x1xf32>
    %189 = arith.mulf %165, %188 : vector<8x1xf32>
    %cst_55 = arith.constant -5.000000e-01 : f32
    %190 = vector.broadcast %cst_55 : f32 to vector<1x1xf32>
    %191 = arith.mulf %162, %190 : vector<1x1xf32>
    %192 = arith.addf %163, %191 : vector<1x1xf32>
    %193 = arith.addf %45, %187 : vector<8x128xf32>
    %194 = vector.broadcast %189 : vector<8x1xf32> to vector<8x128xf32>
    %195 = arith.mulf %194, %193 : vector<8x128xf32>
    %196 = vector.broadcast %192 : vector<1x1xf32> to vector<8x128xf32>
    %197 = arith.addf %195, %196 : vector<8x128xf32>
    %cst_56 = arith.constant 0.000000e+00 : f32
    %198 = vector.broadcast %cst_56 : f32 to vector<8x128xf32>
    %199 = arith.cmpf ogt, %197, %198 : vector<8x128xf32>
    %cst_57 = arith.constant 1.000000e+00 : f32
    %200 = vector.broadcast %cst_57 : f32 to vector<8x128xf32>
    %201 = arith.addf %197, %200 : vector<8x128xf32>
    %cst_58 = arith.constant 0.000000e+00 : f32
    %202 = vector.broadcast %cst_58 : f32 to vector<8x128xf32>
    %203 = arith.minimumf %197, %202 : vector<8x128xf32>
    %204 = math.exp %203 : vector<8x128xf32>
    %205 = arith.select %199, %201, %204 : vector<8x128xi1>, vector<8x128xf32>
    %206 = arith.mulf %205, %51 : vector<8x128xf32>
    %cst_59 = arith.constant dense<0.000000e+00> : vector<8xf32>
    %207 = vector.multi_reduction <add>, %206, %cst_59 [1] : vector<8x128xf32> to vector<8xf32>
    %208 = vector.shape_cast %207 : vector<8xf32> to vector<8x1xf32>
    %209 = arith.mulf %165, %208 : vector<8x1xf32>
    %210 = vector.broadcast %164 : vector<1x1xf32> to vector<8x1xf32>
    %211 = arith.mulf %210, %209 : vector<8x1xf32>
    %212 = arith.addf %161, %211 : vector<8x1xf32>
    %c0_60 = arith.constant 0 : index
    %c3 = arith.constant 3 : index
    %213 = vector.load %arg5[%c0_60, %c3] : memref<1x4xf32, #tpu.memory_space<vmem>>, vector<1x1xf32>
    %c0_61 = arith.constant 0 : index
    %c3_62 = arith.constant 3 : index
    %214 = vector.load %arg6[%c0_61, %c3_62] : memref<1x4xf32, #tpu.memory_space<vmem>>, vector<1x1xf32>
    %c0_63 = arith.constant 0 : index
    %c3_64 = arith.constant 3 : index
    %215 = vector.load %arg7[%c0_63, %c3_64] : memref<1x4xf32, #tpu.memory_space<vmem>>, vector<1x1xf32>
    %216 = vector.extract_strided_slice %39 {offsets = [0, 3], sizes = [8, 1], strides = [1, 1]} : vector<8x4xf32> to vector<8x1xf32>
    %c384_i32 = arith.constant 384 : i32
    %217 = vector.broadcast %c384_i32 : i32 to vector<8x128xi32>
    %218 = arith.addi %58, %217 : vector<8x128xi32>
    %c16_i32_65 = arith.constant 16 : i32
    %219 = vector.broadcast %c16_i32_65 : i32 to vector<8x128xi32>
    %220 = arith.shrui %218, %219 : vector<8x128xi32>
    %221 = arith.xori %218, %220 : vector<8x128xi32>
    %c2146121005_i32_66 = arith.constant 2146121005 : i32
    %222 = vector.broadcast %c2146121005_i32_66 : i32 to vector<8x128xi32>
    %223 = arith.muli %221, %222 : vector<8x128xi32>
    %c15_i32_67 = arith.constant 15 : i32
    %224 = vector.broadcast %c15_i32_67 : i32 to vector<8x128xi32>
    %225 = arith.shrui %223, %224 : vector<8x128xi32>
    %226 = arith.xori %223, %225 : vector<8x128xi32>
    %c-2073254261_i32_68 = arith.constant -2073254261 : i32
    %227 = vector.broadcast %c-2073254261_i32_68 : i32 to vector<8x128xi32>
    %228 = arith.muli %226, %227 : vector<8x128xi32>
    %c16_i32_69 = arith.constant 16 : i32
    %229 = vector.broadcast %c16_i32_69 : i32 to vector<8x128xi32>
    %230 = arith.shrui %228, %229 : vector<8x128xi32>
    %231 = arith.xori %228, %230 : vector<8x128xi32>
    %c8_i32_70 = arith.constant 8 : i32
    %232 = vector.broadcast %c8_i32_70 : i32 to vector<8x128xi32>
    %233 = arith.shrui %231, %232 : vector<8x128xi32>
    %234 = arith.sitofp %233 : vector<8x128xi32> to vector<8x128xf32>
    %cst_71 = arith.constant 5.96046448E-8 : f32
    %235 = vector.broadcast %cst_71 : f32 to vector<8x128xf32>
    %236 = arith.mulf %234, %235 : vector<8x128xf32>
    %cst_72 = arith.constant 0.000000e+00 : f32
    %237 = vector.broadcast %cst_72 : f32 to vector<8x128xf32>
    %238 = arith.select %47, %236, %237 : vector<8x128xi1>, vector<8x128xf32>
    %239 = vector.broadcast %213 : vector<1x1xf32> to vector<8x1xf32>
    %240 = arith.mulf %216, %239 : vector<8x1xf32>
    %cst_73 = arith.constant -5.000000e-01 : f32
    %241 = vector.broadcast %cst_73 : f32 to vector<1x1xf32>
    %242 = arith.mulf %213, %241 : vector<1x1xf32>
    %243 = arith.addf %214, %242 : vector<1x1xf32>
    %244 = arith.addf %45, %238 : vector<8x128xf32>
    %245 = vector.broadcast %240 : vector<8x1xf32> to vector<8x128xf32>
    %246 = arith.mulf %245, %244 : vector<8x128xf32>
    %247 = vector.broadcast %243 : vector<1x1xf32> to vector<8x128xf32>
    %248 = arith.addf %246, %247 : vector<8x128xf32>
    %cst_74 = arith.constant 0.000000e+00 : f32
    %249 = vector.broadcast %cst_74 : f32 to vector<8x128xf32>
    %250 = arith.cmpf ogt, %248, %249 : vector<8x128xf32>
    %cst_75 = arith.constant 1.000000e+00 : f32
    %251 = vector.broadcast %cst_75 : f32 to vector<8x128xf32>
    %252 = arith.addf %248, %251 : vector<8x128xf32>
    %cst_76 = arith.constant 0.000000e+00 : f32
    %253 = vector.broadcast %cst_76 : f32 to vector<8x128xf32>
    %254 = arith.minimumf %248, %253 : vector<8x128xf32>
    %255 = math.exp %254 : vector<8x128xf32>
    %256 = arith.select %250, %252, %255 : vector<8x128xi1>, vector<8x128xf32>
    %257 = arith.mulf %256, %51 : vector<8x128xf32>
    %cst_77 = arith.constant dense<0.000000e+00> : vector<8xf32>
    %258 = vector.multi_reduction <add>, %257, %cst_77 [1] : vector<8x128xf32> to vector<8xf32>
    %259 = vector.shape_cast %258 : vector<8xf32> to vector<8x1xf32>
    %260 = arith.mulf %216, %259 : vector<8x1xf32>
    %261 = vector.broadcast %215 : vector<1x1xf32> to vector<8x1xf32>
    %262 = arith.mulf %261, %260 : vector<8x1xf32>
    %263 = arith.addf %212, %262 : vector<8x1xf32>
    %c0_78 = arith.constant 0 : index
    %c0_79 = arith.constant 0 : index
    %264 = vector.load %arg8[%c0_78, %c0_79] : memref<1x1xf32, #tpu.memory_space<vmem>>, vector<1x1xf32>
    %265 = vector.broadcast %264 : vector<1x1xf32> to vector<8x1xf32>
    %266 = arith.addf %263, %265 : vector<8x1xf32>
    %cst_80 = arith.constant 3.000000e+01 : f32
    %267 = vector.broadcast %cst_80 : f32 to vector<8x1xf32>
    %268 = arith.minimumf %266, %267 : vector<8x1xf32>
    %cst_81 = arith.constant 0.000000e+00 : f32
    %269 = vector.broadcast %cst_81 : f32 to vector<8x3xf32>
    %270 = tpu.concatenate %33, %268, %269 in 1 : vector<8x4xf32>, vector<8x1xf32>, vector<8x3xf32> -> vector<8x8xf32>
    %c0_82 = arith.constant 0 : index
    %c0_83 = arith.constant 0 : index
    %271 = vector.load %arg9[%c0_82, %c0_83] : memref<8x8xf32, #tpu.memory_space<vmem>>, vector<8x8xf32>
    tpu.vector_store %arg9[%c0_82, %c0_83], %270 {strides = array<i32>} : memref<8x8xf32, #tpu.memory_space<vmem>>, vector<8x8xf32>,
    return
  }
  func.func @transform_0(%arg0: i32, %arg1: memref<1xi32, #tpu.memory_space<smem>>) -> (i32, i32) {
    %c0_i32 = arith.constant 0 : i32
    %c0_i32_0 = arith.constant 0 : i32
    return %arg0, %c0_i32 : i32, i32
  }
  func.func @transform_1(%arg0: i32, %arg1: memref<1xi32, #tpu.memory_space<smem>>) -> (i32, i32) {
    %c0_i32 = arith.constant 0 : i32
    %c0_i32_0 = arith.constant 0 : i32
    %c0_i32_1 = arith.constant 0 : i32
    return %c0_i32, %c0_i32_0 : i32, i32
  }
  func.func @transform_2(%arg0: i32, %arg1: memref<1xi32, #tpu.memory_space<smem>>) -> (i32, i32) {
    %c0_i32 = arith.constant 0 : i32
    %c0_i32_0 = arith.constant 0 : i32
    %c0_i32_1 = arith.constant 0 : i32
    return %c0_i32, %c0_i32_0 : i32, i32
  }
  func.func @transform_3(%arg0: i32, %arg1: memref<1xi32, #tpu.memory_space<smem>>) -> (i32, i32) {
    %c0_i32 = arith.constant 0 : i32
    %c0_i32_0 = arith.constant 0 : i32
    %c0_i32_1 = arith.constant 0 : i32
    return %c0_i32, %c0_i32_0 : i32, i32
  }
  func.func @transform_4(%arg0: i32, %arg1: memref<1xi32, #tpu.memory_space<smem>>) -> (i32, i32) {
    %c0_i32 = arith.constant 0 : i32
    %c0_i32_0 = arith.constant 0 : i32
    %c0_i32_1 = arith.constant 0 : i32
    return %c0_i32, %c0_i32_0 : i32, i32
  }
  func.func @transform_5(%arg0: i32, %arg1: memref<1xi32, #tpu.memory_space<smem>>) -> (i32, i32) {
    %c0_i32 = arith.constant 0 : i32
    %c0_i32_0 = arith.constant 0 : i32
    %c0_i32_1 = arith.constant 0 : i32
    return %c0_i32, %c0_i32_0 : i32, i32
  }
  func.func @transform_6(%arg0: i32, %arg1: memref<1xi32, #tpu.memory_space<smem>>) -> (i32, i32) {
    %c0_i32 = arith.constant 0 : i32
    %c0_i32_0 = arith.constant 0 : i32
    %c0_i32_1 = arith.constant 0 : i32
    return %c0_i32, %c0_i32_0 : i32, i32
  }
  func.func @transform_7(%arg0: i32, %arg1: memref<1xi32, #tpu.memory_space<smem>>) -> (i32, i32) {
    %c0_i32 = arith.constant 0 : i32
    %c0_i32_0 = arith.constant 0 : i32
    return %arg0, %c0_i32 : i32, i32
  }
}

</mosaic_0001>

<bundles_post_ra>
// kernel: tpu_custom_call.1
= control target key start
LH: loop header
LB: loop body
LE: loop exit
PB: predicated region body
PF: predicated region fallthrough
CT: control target
= control target key end

     0   :  { %s475_s0 = inlined_call_operand.<no memory space> [shape: s32[1], index: 0, kind: input, shape index: {}]   ;;  %s476_s1 = inlined_call_operand.vmem [shape: f32[8,5], index: 1, kind: input, shape index: {}]   ;;  %s477_s2 = inlined_call_operand.vmem [shape: f32[5,4], index: 2, kind: input, shape index: {}]   ;;  %s478_s3 = inlined_call_operand.vmem [shape: f32[1,4], index: 3, kind: input, shape index: {}]   ;;  %s479_s4 = inlined_call_operand.vmem [shape: f32[1,4], index: 4, kind: input, shape index: {}]   ;;  %s480_s5 = inlined_call_operand.vmem [shape: f32[1,4], index: 5, kind: input, shape index: {}]   ;;  %s481_s6 = inlined_call_operand.vmem [shape: f32[1,4], index: 6, kind: input, shape index: {}]   ;;  %s482_s7 = inlined_call_operand.<no memory space> [shape: f32[1,1], index: 7, kind: input, shape index: {}]   ;;  %s483_s8 = inlined_call_operand.hbm [shape: f32[8,8], index: 8, kind: output, shape index: {}]  }
   0x1   :  { %v14_v0 = vstv %s482_s7 }
   0x2   :  { %15 = vst [vmem:[#allocation4] sm:$0x1] %v14_v0 }
   0x3   :  { %v31_v1 = vld [vmem:[%s476_s1] sm:$0xff]  ;;  %v361_v2 = vmov 0   ;;  %v362_v3 = vmov 2   ;;  %v363_v4 = vmov 4  }
   0x4   :  { %309 = vset.pattern.permute.xlu0 %v361_v2  ;;  %311 = vset.pattern.permute.xlu1 %v362_v3 }
   0x5   :  { %35 = vperm.xlu0 %309, %v31_v1   ;;  %53 = vperm.xlu1 %311, %v31_v1  }
   0x6   :  { %313 = vset.pattern.permute.xlu2 %v363_v4 }
   0x7   :  { %16 = vsyncpa [#allocation6], 0  ;;  %67 = vperm.xlu2 %313, %v31_v1   ;;  %v364_v5 = vmov 1   ;;  %v365_v6 = vmov 3   ;;  %v94_v7 = vld [vmem:[%s479_s4] sm:$0x1]  ;;  %v76_v39 = vlaneseq }
   0x8   :  { %v113_v8 = vmul.f32 -0.5, %v94_v7  ;;  %v95_v9 = vld [vmem:[%s480_s5] sm:$0x1]  ;;  %s89_s15 = smul.u32 2654435769, %s475_s0  ;;  %s367_s17 = smov 127  }
   0x9   :  { %v32_v12 = vld [vmem:[%s477_s2] sm:$0x1f]  ;;  %v77_v40 = vshrl.u32 %v76_v39, 7  ;;  %v446_v41 = vand.u32 127, %v76_v39  ;;  %s368_s18 = smov 126   ;;  %s369_s19 = smov 125  }
   0xa   :  { %v114_v10 = vadd.f32 %v113_v8, %v95_v9  ;;  %v38_v15 = vperm.slane %v32_v12, 0  ;;  %v323_v16 = vld [vmem:[%s478_s3] ss:$0 sm:$0xff]  ;;  %v49_v18 = vperm.slane %v32_v12, 1  ;;  %v56_v19 = vperm.slane %v32_v12, 2  ;;  %s371_s20 = smov [#allocation5]  }
   0xb   :  { %v63_v20 = vperm.slane %v32_v12, 3  ;;  %v70_v25 = vperm.slane %v32_v12, 4  ;;  %v324_v36 = vld [vmem:[%s479_s4] ss:$0 sm:$0xff]  ;;  %v90_v42 = vmul.u32 512, %v77_v40  ;;  %v92_v44 = vstv %s89_s15  ;;  %s285_s21 = sshll.u32 %s371_s20, 4  ;;  %s286_s21 = int_to_ptr.vmem [resolvable:$true] %s285_s21 }
   0xc   :  { %v123_v11 = vperm.slane %v114_v10, 0  ;;  %vm84_vm0 = vcmp.lt.s32.totalorder %v446_v41, 99  ;;  %vm85_vm1 = vcmp.lt.s32.totalorder %v446_v41, 100  ;;  %vm274_vm6 = vcmask 31744   ;;  %s287_s24 = sshll.u32 %s483_s8, 4  ;;  %s288_s24 = int_to_ptr.hbm [resolvable:$true] %s287_s24 }
   0xd   :  { %310 = vset.pattern.permute.xlu0 %v364_v5  ;;  %312 = vset.pattern.permute.xlu1 %v365_v6  ;;  %v91_v43 = vadd.s32 %v90_v42, %v446_v41  ;;  %vm276_vm7 = vcmask 39936   ;;  %vm278_vm8 = vcmask 64512  }
   0xe   :  { %46 = vperm.xlu0 %310, %v31_v1   ;;  %60 = vperm.xlu1 %312, %v31_v1  }
   0xf   :  { %316 = vset.pattern.permute.xlu2 %v364_v5  ;;  %v93_v45 = vadd.s32 %v92_v44, %v91_v43 }
  0x11   :  { %v144_v46 = vadd.s32 128, %v93_v45  ;;  %v184_v49 = vadd.s32 256, %v93_v45  ;;  %v224_v57 = vadd.s32 384, %v93_v45  ;;  %v97_v4 = vshrl.u32 %v93_v45, 16 }
  0x13   :  { %v145_v47 = vshrl.u32 %v144_v46, 16  ;;  %v185_v51 = vshrl.u32 %v184_v49, 16  ;;  %v225_v60 = vshrl.u32 %v224_v57, 16  ;;  %v98_v8 = vxor.u32 %v97_v4, %v93_v45 }
  0x14   :  { %v366_v45 = vmov 0.0  }
  0x15   :  { %v146_v48 = vxor.u32 %v145_v47, %v144_v46  ;;  %v186_v53 = vxor.u32 %v185_v51, %v184_v49  ;;  %v226_v63 = vxor.u32 %v225_v60, %v224_v57  ;;  %v99_v12 = vmul.u32 2146121005, %v98_v8 }
  0x16   :  { %314 = vset.pattern.permute.xlu1 %v364_v5  ;;  %315 = vset.pattern.permute.xlu0 %v362_v3  ;;  %v297_v46 = vsel %vm85_vm1, 1.0, %v366_v45 }
  0x17   :  { %164 = vperm.xlu1 %314, %v123_v11   ;;  %204 = vperm.xlu0 %315, %v123_v11   ;;  %v147_v50 = vmul.u32 2146121005, %v146_v48  ;;  %v187_v55 = vmul.u32 2146121005, %v186_v53 }
  0x19   :  { %v148_v52 = vshrl.u32 %v147_v50, 15  ;;  %v188_v58 = vshrl.u32 %v187_v55, 15 }
  0x1b   :  { %v149_v54 = vxor.u32 %v148_v52, %v147_v50  ;;  %v189_v61 = vxor.u32 %v188_v58, %v187_v55 }
  0x1d   :  { %v150_v56 = vmul.u32 2221713035, %v149_v54  ;;  %v190_v0 = vmul.u32 2221713035, %v189_v61 }
  0x1f   :  { %318 = vset.pattern.permute.xlu1 %v365_v6  ;;  %322 = vset.pattern.permute.xlu0 %v365_v6  ;;  %v151_v59 = vshrl.u32 %v150_v56, 16 }
  0x21   :  { %v152_v62 = vxor.u32 %v151_v59, %v150_v56 }
  0x23   :  { %v153_v1 = vshrl.u32 %v152_v62, 8 }
  0x25   :  { %v154_v5 = vcvt.s32.f32 %v153_v1 }
  0x27   :  { %v155_v9 = vmul.f32 5.9604645e-08, %v154_v5 }
  0x61   :  { %v68_v26 = vpop.permute.xlu2 %67 }
  0x62   :  { %v71_v31 = vmul.f32 %v70_v25, %v68_v26 }
  0x77   :  { %v36_v13 = vpop.permute.xlu0 %35  ;;  %v54_v14 = vpop.permute.xlu1 %53 }
  0x78   :  { %v39_v17 = vmul.f32 %v38_v15, %v36_v13  ;;  %v57_v27 = vmul.f32 %v56_v19, %v54_v14  ;;  %v83_v13 = vcvt.s32.f32 %v446_v41  ;;  %v156_v14 = vsel %vm84_vm0, %v155_v9, 0.0 }
  0x7a   :  { %v44_v23 = vadd.f32 %v323_v16, %v39_v17  ;;  %v100_v17 = vshrl.u32 %v99_v12, 15 }
  0x80   :  { %v47_v21 = vpop.permute.xlu0 %46  ;;  %v61_v22 = vpop.permute.xlu1 %60 }
  0x81   :  { %v50_v24 = vmul.f32 %v49_v18, %v47_v21  ;;  %v64_v29 = vmul.f32 %v63_v20, %v61_v22  ;;  %v157_v18 = vadd.f32 %v156_v14, %v83_v13  ;;  %v101_v21 = vxor.u32 %v100_v17, %v99_v12 }
  0x83   :  { %v51_v28 = vadd.f32 %v50_v24, %v44_v23 }
  0x85   :  { %v58_v30 = vadd.f32 %v57_v27, %v51_v28  ;;  %v102_v28 = vmul.u32 2221713035, %v101_v21 }
  0x87   :  { %v65_v32 = vadd.f32 %v64_v29, %v58_v30 }
  0x89   :  { %v436_v33 = vadd.f32 %v71_v31, %v65_v32  ;;  %v165_v23 = vpop.permute.xlu1 %164 }
  0x8b   :  { %v73_v34 = vmax.f32 %v436_v33, -0.5 }
  0x8d   :  { %v296_v35 = vadd.f32 0.5, %v73_v34  ;;  %v103_v34 = vshrl.u32 %v102_v28, 16 }
  0x8f   :  { %v442_v37 = vmul.f32 0.01010101, %v296_v35  ;;  %v104_v40 = vxor.u32 %v103_v34, %v102_v28 }
  0x91   :  { %v112_v38 = vmul.f32 %v324_v36, %v442_v37  ;;  %v205_v36 = vpop.permute.xlu0 %204  ;;  %v105_v49 = vshrl.u32 %v104_v40, 8 }
  0x93   :  { %239 = vperm.xlu1 %318, %v112_v38   ;;  %159 = vperm.xlu2 %316, %v112_v38   ;;  %v106_v54 = vcvt.s32.f32 %v105_v49 }
  0x95   :  { %v107_v58 = vmul.f32 5.9604645e-08, %v106_v54 }
  0x97   :  { %v108_v1 = vsel %vm84_vm0, %v107_v58, 0.0 }
  0x9b   :  { %321 = vset.pattern.permute.xlu1 %v361_v2  ;;  %317 = vset.pattern.permute.xlu2 %v362_v3  ;;  %v191_v3 = vshrl.u32 %v190_v0, 16 }
  0x9c   :  { %118 = vperm.xlu1 %321, %v112_v38   ;;  %199 = vperm.xlu2 %317, %v112_v38  }
  0x9d   :  { %v192_v7 = vxor.u32 %v191_v3, %v190_v0  ;;  %v115_v3 = vadd.f32 %v108_v1, %v83_v13 }
  0xa4   :  { %319 = vset.pattern.permute.xlu2 %v365_v6 }
  0xa5   :  { %244 = vperm.xlu2 %319, %v123_v11  }
  0xad   :  { %320 = vset.pattern.permute.xlu2 %v361_v2  ;;  %v227_v2 = vmul.u32 2146121005, %v226_v63 }
  0xae   :  { %125 = vperm.xlu2 %320, %v123_v11   ;;  %v193_v11 = vshrl.u32 %v192_v7, 8 }
  0xaf   :  { %v228_v6 = vshrl.u32 %v227_v2, 15 }
  0xb0   :  { %v194_v16 = vcvt.s32.f32 %v193_v11 }
  0xb1   :  { %v229_v10 = vxor.u32 %v228_v6, %v227_v2 }
  0xb2   :  { %v195_v20 = vmul.f32 5.9604645e-08, %v194_v16 }
  0xb3   :  { %v230_v15 = vmul.u32 2221713035, %v229_v10 }
  0xb4   :  { %v196_v27 = vsel %vm84_vm0, %v195_v20, 0.0 }
  0xb5   :  { %v231_v19 = vshrl.u32 %v230_v15, 16  ;;  %v197_v30 = vadd.f32 %v196_v27, %v83_v13 }
  0xb7   :  { %v232_v25 = vxor.u32 %v231_v19, %v230_v15 }
  0xb9   :  { %v233_v31 = vshrl.u32 %v232_v25, 8 }
  0xbb   :  { %v234_v39 = vcvt.s32.f32 %v233_v31 }
  0xbd   :  { %v235_v47 = vmul.f32 5.9604645e-08, %v234_v39 }
  0xbf   :  { %v236_v53 = vsel %vm84_vm0, %v235_v47, 0.0 }
  0xc0   :  { %v237_v55 = vadd.f32 %v236_v53, %v83_v13 }
  0xed   :  { %v160_v22 = vpop.permute.xlu2 %159 }
  0xee   :  { %v162_v24 = vmul.f32 %v160_v22, %v157_v18  ;;  %v325_v18 = vld [vmem:[%s481_s6] ss:$0 sm:$0xff]  ;;  %s370_s6 = smov 4  }
  0xf0   :  { %v167_v26 = vadd.f32 %v165_v23, %v162_v24 }
  0xf2   :  { %v170_v29 = vmin.f32 %v167_v26, 0.0  ;;  %v169_v43 = vadd.f32 1.0, %v167_v26  ;;  %vm168_vm2 = vcmp.gt.f32.partialorder %v167_v26, 0.0 }
  0xf4   :  { %v171_v32 = vmul.f32 1.442695, %v170_v29 }
  0xf6   :  { %327 = vpow2.f32 %v171_v32  ;;  %v200_v35 = vpop.permute.xlu2 %199 }
  0xf7   :  { %v202_v38 = vmul.f32 %v200_v35, %v197_v30 }
  0xf9   :  { %v207_v42 = vadd.f32 %v205_v36, %v202_v38  ;;  %v326_v36 = vld [vmem:[#allocation4] ss:$0 sm:$0xff] }
  0xfb   :  { %v210_v44 = vmin.f32 %v207_v42, 0.0  ;;  %v209_v56 = vadd.f32 1.0, %v207_v42  ;;  %vm208_vm3 = vcmp.gt.f32.partialorder %v207_v42, 0.0 }
  0xfc   :  { %v328_v48 = vpop.eup %327 }
  0xfd   :  { %v211_v50 = vmul.f32 1.442695, %v210_v44  ;;  %v173_v51 = vsel %vm168_vm2, %v169_v43, %v328_v48 }
  0xfe   :  { %v174_v52 = vmul.f32 %v297_v46, %v173_v51 }
  0xff   :  { %329 = vpow2.f32 %v211_v50  ;;  %v245_v57 = vpop.permute.xlu2 %244 }
 0x100   :  { %175 = vadd.xlane.f32.xlu0 %v174_v52 }
 0x105   :  { %v330_v59 = vpop.eup %329  ;;  %v240_v60 = vpop.permute.xlu1 %239 }
 0x106   :  { %v242_v61 = vmul.f32 %v240_v60, %v237_v55  ;;  %v213_v62 = vsel %vm208_vm3, %v209_v56, %v330_v59 }
 0x107   :  { %v214_v63 = vmul.f32 %v297_v46, %v213_v62 }
 0x108   :  { %v247_v0 = vadd.f32 %v245_v57, %v242_v61  ;;  %v126_v6 = vpop.permute.xlu2 %125 }
 0x109   :  { %215 = vadd.xlane.f32.xlu1 %v214_v63 }
 0x10a   :  { %v250_v2 = vmin.f32 %v247_v0, 0.0  ;;  %v249_v9 = vadd.f32 1.0, %v247_v0  ;;  %vm248_vm4 = vcmp.gt.f32.partialorder %v247_v0, 0.0 }
 0x10c   :  { %v251_v4 = vmul.f32 1.442695, %v250_v2 }
 0x10e   :  { %331 = vpow2.f32 %v251_v4  ;;  %v119_v5 = vpop.permute.xlu1 %118 }
 0x10f   :  { %v121_v7 = vmul.f32 %v119_v5, %v115_v3 }
 0x111   :  { %v128_v8 = vadd.f32 %v126_v6, %v121_v7 }
 0x113   :  { %v131_v10 = vmin.f32 %v128_v8, 0.0  ;;  %v130_v41 = vadd.f32 1.0, %v128_v8  ;;  %vm129_vm5 = vcmp.gt.f32.partialorder %v128_v8, 0.0 }
 0x114   :  { %v332_v11 = vpop.eup %331 }
 0x115   :  { %v132_v12 = vmul.f32 1.442695, %v131_v10  ;;  %v253_v14 = vsel %vm248_vm4, %v249_v9, %v332_v11 }
 0x116   :  { %v254_v15 = vmul.f32 %v297_v46, %v253_v14 }
 0x117   :  { %333 = vpow2.f32 %v132_v12 }
 0x118   :  { %255 = vadd.xlane.f32.xlu2 %v254_v15 }
 0x11d   :  { %v334_v16 = vpop.eup %333 }
 0x11e   :  { %v134_v17 = vsel %vm129_vm5, %v130_v41, %v334_v16 }
 0x11f   :  { %v135_v13 = vmul.f32 %v297_v46, %v134_v17 }
 0x121   :  { %136 = vadd.xlane.f32.xlu2 %v135_v13 }
 0x173   :  { %v176_v19 = vpop.xlane.xlu0 %175 }
 0x174   :  { %v177_v20 = vmul.f32 %v176_v19, %v442_v37 }
 0x176   :  { %v178_v21 = vmul.f32 %v325_v18, %v177_v20 }
 0x178   :  { %180 = vrot.lane.b32.xlu0 %v178_v21, %s367_s17 }
 0x17c   :  { %v216_v22 = vpop.xlane.xlu1 %215 }
 0x17d   :  { %v217_v23 = vmul.f32 %v216_v22, %v442_v37 }
 0x17f   :  { %v218_v24 = vmul.f32 %v325_v18, %v217_v23 }
 0x181   :  { %220 = vrot.lane.b32.xlu1 %v218_v24, %s368_s18 }
 0x18b   :  { %v256_v25 = vpop.xlane.xlu2 %255 }
 0x18c   :  { %v257_v26 = vmul.f32 %v256_v25, %v442_v37 }
 0x18e   :  { %v258_v27 = vmul.f32 %v325_v18, %v257_v26 }
 0x190   :  { %260 = vrot.lane.b32.xlu2 %v258_v27, %s369_s19 }
 0x194   :  { %v137_v28 = vpop.xlane.xlu2 %136 }
 0x195   :  { %v138_v29 = vmul.f32 %v137_v28, %v442_v37 }
 0x197   :  { %v142_v31 = vmul.f32 %v325_v18, %v138_v29 }
 0x1ea   :  { %v181_v30 = vpop.permute.xlu0 %180  ;;  %v261_v38 = vpop.permute.xlu2 %260 }
 0x1eb   :  { %v183_v32 = vadd.f32 %v181_v30, %v142_v31 }
 0x1f3   :  { %v221_v34 = vpop.permute.xlu1 %220 }
 0x1f4   :  { %v223_v35 = vadd.f32 %v221_v34, %v183_v32 }
 0x1f6   :  { %v263_v39 = vadd.f32 %v261_v38, %v223_v35 }
 0x1f8   :  { %v268_v40 = vadd.f32 %v326_v36, %v263_v39 }
 0x1fa   :  { %v269_v42 = vmin.f32 %v268_v40, 30.0 }
 0x1fc   :  { %271 = vrot.lane.b32.xlu0 %v269_v42, %s370_s6 }
 0x26e   :  { %v272_v37 = vpop.permute.xlu0 %271 }
 0x26f   :  { %v275_v43 = vsel %vm274_vm6, %v436_v33, %v272_v37 }
 0x270   :  { %v277_v44 = vsel %vm276_vm7, %v275_v43, 0.0 }
 0x271   :  { %279 = vst.msk [vmem:[#allocation5] sm:$0xff] %vm278_vm8, %v277_v44 }
 0x272   :  { %290 = dma.vmem_to_hbm [thread:$0]  %s286_s21, 128, %s288_s24, [#allocation6]  }
 0x273   :  { %359 = dma.done.wait [#allocation6], 128  }
 0x274   :  { %360 = vsyncadd [#allocation6], 4294967168 }
 0x275   :  { %295 = vsyncpa [#allocation6], 1 }

</bundles_post_ra>
